<compile_context>
chip_gen: v7x
topology: tpu7x:2x2x1
jax: 0.10.0
libtpu: 0.0.40
codegen_flags: <defaults>
</compile_context>

<pallas_src>
import jax
import jax.numpy as jnp
from jax import lax
from jax.experimental import pallas as pl
from jax.experimental.pallas import tpu as pltpu


def _disc_kernel(x_ref, w1_ref, b1_ref, w2_ref, b2_ref, w3_ref, b3_ref, o_ref):
    x = x_ref[...]                                                        # (TB, 32) native layout

    # Linear(32, 64) + LeakyReLU(0.01):
    #   contract w1 (64,32) dim 1 with x (TB,32) dim 1 -> (64, TB)  (feature-major, batch on lanes)
    h1 = lax.dot_general(
        w1_ref[...], x,
        dimension_numbers=(((1,), (1,)), ((), ())),
        preferred_element_type=jnp.float32,
    ) + b1_ref[...]
    h1 = jnp.maximum(h1, 0.01 * h1)                                       # (64, TB)

    # Linear(64, 64) + LeakyReLU(0.01):  (64,64) @ (64,TB) + (64,1)
    h2 = jnp.dot(w2_ref[...], h1, preferred_element_type=jnp.float32) + b2_ref[...]
    h2 = jnp.maximum(h2, 0.01 * h2)                                       # (64, TB)

    # Linear(64, 1) + Sigmoid:  (1,64) @ (64,TB) + (1,1) -> lane-dense (1, TB)
    z = jnp.dot(w3_ref[...], h2, preferred_element_type=jnp.float32) + b3_ref[...]
    o_ref[...] = jax.nn.sigmoid(z).astype(o_ref.dtype)


def _round_up(n, m):
    return ((n + m - 1) // m) * m


def discriminator_forward(x, params, *, batch_tile=4096):
    """x: (B, 32) float32 (native PyTorch layout).
    params: PyTorch-layout weights w{1,2,3}: (out, in), biases b{1,2,3}: (out, 1).
    Returns (B, 1) float32 sigmoid probabilities."""
    B, D = x.shape
    assert D == 32

    w1, b1 = params["w1"], params["b1"]   # (64, 32), (64, 1)
    w2, b2 = params["w2"], params["b2"]   # (64, 64), (64, 1)
    w3, b3 = params["w3"], params["b3"]   # (1, 64),  (1, 1)

    # Tile sizing: clamp to the (128-rounded) batch, keep a multiple of 128 so the
    # (1, TB) output block is lane-dense / unmasked.
    b128 = _round_up(B, 128)
    tb = min(_round_up(batch_tile, 128), b128)
    # Prefer >= 2 grid steps when the batch allows it (megacore sharding on v7x).
    if b128 >= 2 * 128 and _round_up(B, tb) // tb < 2:
        tb = _round_up(pl.cdiv(b128, 2), 128)

    Bp = _round_up(B, tb)
    if Bp != B:
        # Only the ragged tail gets padded (zeros; padded rows are sliced off below).
        x = jnp.pad(x, ((0, Bp - B), (0, 0)))

    grid = (Bp // tb,)

    def full(shape):
        # Tiny weights / biases: fully resident, same (constant) block every grid step.
        return pl.BlockSpec(shape, lambda i: tuple(0 for _ in shape))

    out2 = pl.pallas_call(
        _disc_kernel,
        out_shape=jax.ShapeDtypeStruct((1, Bp), jnp.float32),
        grid_spec=pltpu.PrefetchScalarGridSpec(
            num_scalar_prefetch=0,
            grid=grid,
            in_specs=[
                pl.BlockSpec((tb, 32), lambda i: (i, 0)),   # x tile, native (B, 32) layout
                full(w1.shape), full(b1.shape),
                full(w2.shape), full(b2.shape),
                full(w3.shape), full(b3.shape),
            ],
            out_specs=pl.BlockSpec((1, tb), lambda i: (0, i)),  # lane-dense output
        ),
        compiler_params=pltpu.CompilerParams(
            dimension_semantics=("parallel",),
        ),
    )(x, w1, b1, w2, b2, w3, b3)

    # (1, Bp) -> (Bp, 1) is an order-preserving reshape; slice off padded rows.
    return out2.reshape(Bp, 1)[:B]


def init_params(key):
    """Deterministic init mimicking nn.Linear default (U[-1/sqrt(fan_in), 1/sqrt(fan_in)]).
    Weights stored PyTorch-style as (out_features, in_features); biases as (out, 1)."""
    def linear(key, fan_in, fan_out):
        kw, kb = jax.random.split(key)
        bound = 1.0 / jnp.sqrt(jnp.float32(fan_in))
        w = jax.random.uniform(kw, (fan_out, fan_in), jnp.float32, -bound, bound)
        b = jax.random.uniform(kb, (fan_out, 1), jnp.float32, -bound, bound)
        return w, b

    k1, k2, k3 = jax.random.split(key, 3)
    w1, b1 = linear(k1, 32, 64)
    w2, b2 = linear(k2, 64, 64)
    w3, b3 = linear(k3, 64, 1)
    return {"w1": w1, "b1": b1, "w2": w2, "b2": b2, "w3": w3, "b3": b3}


def _reference(x, p):
    """Pure-JAX reference matching the PyTorch module: y = x @ W.T + b."""
    def lrelu(v):
        return jnp.where(v > 0, v, 0.01 * v)
    h = lrelu(x @ p["w1"].T + p["b1"][:, 0])
    h = lrelu(h @ p["w2"].T + p["b2"][:, 0])
    return jax.nn.sigmoid(h @ p["w3"].T + p["b3"][:, 0])


if __name__ == "__main__":
    key = jax.random.PRNGKey(0)
    kp, kx = jax.random.split(key)
    params = init_params(kp)

    # Small deterministic test: B=256 rows of 32 features.  The wrapper clamps the
    # 4096 default tile to 128 here -> a 2-step "parallel" grid.  For production-sized
    # batches keep batch_tile=4096 (v5e-safe) or sweep 8192/16384 on v6e/v7x.
    B = 256
    x = jax.random.normal(kx, (B, 32), jnp.float32)

    out = discriminator_forward(x, params)
    out = jax.block_until_ready(out)

    ref = _reference(x, params)
    assert out.shape == (B, 1)
    assert jnp.allclose(out, ref, atol=2e-5, rtol=2e-5), float(jnp.max(jnp.abs(out - ref)))

    print("KERNEL_OK")
</pallas_src>

<mosaic_0001>
module attributes {stable_mosaic.version = 11 : i64} {
  func.func @_disc_kernel(%arg0: i32, %arg1: memref<128x32xf32, #tpu.memory_space<vmem>>, %arg2: memref<64x32xf32, #tpu.memory_space<vmem>>, %arg3: memref<64x1xf32, #tpu.memory_space<vmem>>, %arg4: memref<64x64xf32, #tpu.memory_space<vmem>>, %arg5: memref<64x1xf32, #tpu.memory_space<vmem>>, %arg6: memref<1x64xf32, #tpu.memory_space<vmem>>, %arg7: memref<1x1xf32, #tpu.memory_space<vmem>>, %arg8: memref<1x128xf32, #tpu.memory_space<vmem>>) attributes {dimension_semantics = [#tpu.dimension_semantics<parallel>], iteration_bounds = array<i64: 2>, scalar_prefetch = 0 : i64, scratch_operands = 0 : i64, tpu.core_type = #tpu.core_type<tc>, window_params = [{transform_indices = @transform_0, window_bounds = array<i64: 128, 32>}, {pipeline_mode = #tpu.pipeline_mode<synchronous>, transform_indices = @transform_1, window_bounds = array<i64: 64, 32>}, {pipeline_mode = #tpu.pipeline_mode<synchronous>, transform_indices = @transform_2, window_bounds = array<i64: 64, 1>}, {pipeline_mode = #tpu.pipeline_mode<synchronous>, transform_indices = @transform_3, window_bounds = array<i64: 64, 64>}, {pipeline_mode = #tpu.pipeline_mode<synchronous>, transform_indices = @transform_4, window_bounds = array<i64: 64, 1>}, {pipeline_mode = #tpu.pipeline_mode<synchronous>, transform_indices = @transform_5, window_bounds = array<i64: 1, 64>}, {pipeline_mode = #tpu.pipeline_mode<synchronous>, transform_indices = @transform_6, window_bounds = array<i64: 1, 1>}, {transform_indices = @transform_7, window_bounds = array<i64: 1, 128>}]} {
    %c0 = arith.constant 0 : index
    %c0_0 = arith.constant 0 : index
    %0 = vector.load %arg1[%c0, %c0_0] : memref<128x32xf32, #tpu.memory_space<vmem>>, vector<128x32xf32>
    %c0_1 = arith.constant 0 : index
    %c0_2 = arith.constant 0 : index
    %1 = vector.load %arg2[%c0_1, %c0_2] : memref<64x32xf32, #tpu.memory_space<vmem>>, vector<64x32xf32>
    %cst = arith.constant dense<0.000000e+00> : vector<64x128xf32>
    %2 = tpu.matmul %1, %0, %cst {dimension_numbers = #tpu.dot_dimension_numbers<[1], [1], [0], [0], [0, 0, 1, 0], [], []>} : vector<64x32xf32>, vector<128x32xf32>, vector<64x128xf32> -> vector<64x128xf32>
    %c0_3 = arith.constant 0 : index
    %c0_4 = arith.constant 0 : index
    %3 = vector.load %arg3[%c0_3, %c0_4] : memref<64x1xf32, #tpu.memory_space<vmem>>, vector<64x1xf32>
    %4 = vector.broadcast %3 : vector<64x1xf32> to vector<64x128xf32>
    %5 = arith.addf %2, %4 : vector<64x128xf32>
    %cst_5 = arith.constant 0.00999999977 : f32
    %6 = vector.broadcast %cst_5 : f32 to vector<64x128xf32>
    %7 = arith.mulf %6, %5 : vector<64x128xf32>
    %8 = arith.maximumf %5, %7 : vector<64x128xf32>
    %c0_6 = arith.constant 0 : index
    %c0_7 = arith.constant 0 : index
    %9 = vector.load %arg4[%c0_6, %c0_7] : memref<64x64xf32, #tpu.memory_space<vmem>>, vector<64x64xf32>
    %cst_8 = arith.constant dense<0.000000e+00> : vector<64x128xf32>
    %10 = tpu.matmul %9, %8, %cst_8 {dimension_numbers = #tpu.dot_dimension_numbers<[1], [0], [0], [1], [0, 0, 1, 1], [], []>} : vector<64x64xf32>, vector<64x128xf32>, vector<64x128xf32> -> vector<64x128xf32>
    %c0_9 = arith.constant 0 : index
    %c0_10 = arith.constant 0 : index
    %11 = vector.load %arg5[%c0_9, %c0_10] : memref<64x1xf32, #tpu.memory_space<vmem>>, vector<64x1xf32>
    %12 = vector.broadcast %11 : vector<64x1xf32> to vector<64x128xf32>
    %13 = arith.addf %10, %12 : vector<64x128xf32>
    %cst_11 = arith.constant 0.00999999977 : f32
    %14 = vector.broadcast %cst_11 : f32 to vector<64x128xf32>
    %15 = arith.mulf %14, %13 : vector<64x128xf32>
    %16 = arith.maximumf %13, %15 : vector<64x128xf32>
    %c0_12 = arith.constant 0 : index
    %c0_13 = arith.constant 0 : index
    %17 = vector.load %arg6[%c0_12, %c0_13] : memref<1x64xf32, #tpu.memory_space<vmem>>, vector<1x64xf32>
    %cst_14 = arith.constant dense<0.000000e+00> : vector<1x128xf32>
    %18 = tpu.matmul %17, %16, %cst_14 {dimension_numbers = #tpu.dot_dimension_numbers<[1], [0], [0], [1], [0, 0, 1, 1], [], []>} : vector<1x64xf32>, vector<64x128xf32>, vector<1x128xf32> -> vector<1x128xf32>
    %c0_15 = arith.constant 0 : index
    %c0_16 = arith.constant 0 : index
    %19 = vector.load %arg7[%c0_15, %c0_16] : memref<1x1xf32, #tpu.memory_space<vmem>>, vector<1x1xf32>
    %20 = vector.broadcast %19 : vector<1x1xf32> to vector<1x128xf32>
    %21 = arith.addf %18, %20 : vector<1x128xf32>
    %22 = arith.negf %21 : vector<1x128xf32>
    %23 = math.exp %22 : vector<1x128xf32>
    %cst_17 = arith.constant 1.000000e+00 : f32
    %24 = vector.broadcast %cst_17 : f32 to vector<1x128xf32>
    %25 = arith.addf %24, %23 : vector<1x128xf32>
    %26 = arith.divf %24, %25 : vector<1x128xf32>
    %c0_18 = arith.constant 0 : index
    %c0_19 = arith.constant 0 : index
    %27 = vector.load %arg8[%c0_18, %c0_19] : memref<1x128xf32, #tpu.memory_space<vmem>>, vector<1x128xf32>
    tpu.vector_store %arg8[%c0_18, %c0_19], %26 {strides = array<i32>} : memref<1x128xf32, #tpu.memory_space<vmem>>, vector<1x128xf32>,
    return
  }
  func.func @transform_0(%arg0: i32) -> (i32, i32) {
    %c0_i32 = arith.constant 0 : i32
    %c0_i32_0 = arith.constant 0 : i32
    return %arg0, %c0_i32 : i32, i32
  }
  func.func @transform_1(%arg0: i32) -> (i32, i32) {
    %c0_i32 = arith.constant 0 : i32
    %c0_i32_0 = arith.constant 0 : i32
    %c0_i32_1 = arith.constant 0 : i32
    return %c0_i32, %c0_i32_0 : i32, i32
  }
  func.func @transform_2(%arg0: i32) -> (i32, i32) {
    %c0_i32 = arith.constant 0 : i32
    %c0_i32_0 = arith.constant 0 : i32
    %c0_i32_1 = arith.constant 0 : i32
    return %c0_i32, %c0_i32_0 : i32, i32
  }
  func.func @transform_3(%arg0: i32) -> (i32, i32) {
    %c0_i32 = arith.constant 0 : i32
    %c0_i32_0 = arith.constant 0 : i32
    %c0_i32_1 = arith.constant 0 : i32
    return %c0_i32, %c0_i32_0 : i32, i32
  }
  func.func @transform_4(%arg0: i32) -> (i32, i32) {
    %c0_i32 = arith.constant 0 : i32
    %c0_i32_0 = arith.constant 0 : i32
    %c0_i32_1 = arith.constant 0 : i32
    return %c0_i32, %c0_i32_0 : i32, i32
  }
  func.func @transform_5(%arg0: i32) -> (i32, i32) {
    %c0_i32 = arith.constant 0 : i32
    %c0_i32_0 = arith.constant 0 : i32
    %c0_i32_1 = arith.constant 0 : i32
    return %c0_i32, %c0_i32_0 : i32, i32
  }
  func.func @transform_6(%arg0: i32) -> (i32, i32) {
    %c0_i32 = arith.constant 0 : i32
    %c0_i32_0 = arith.constant 0 : i32
    %c0_i32_1 = arith.constant 0 : i32
    return %c0_i32, %c0_i32_0 : i32, i32
  }
  func.func @transform_7(%arg0: i32) -> (i32, i32) {
    %c0_i32 = arith.constant 0 : i32
    %c0_i32_0 = arith.constant 0 : i32
    return %c0_i32, %arg0 : i32, i32
  }
}

</mosaic_0001>

<bundles_post_ra>
// kernel: tpu_custom_call.1
= control target key start
LH: loop header
LB: loop body
LE: loop exit
PB: predicated region body
PF: predicated region fallthrough
CT: control target
= control target key end

     0   :  { %s1598_s0 = inlined_call_operand.vmem [shape: f32[256,32], index: 0, kind: input, shape index: {}]   ;;  %s1599_s1 = inlined_call_operand.vmem [shape: f32[64,32], index: 1, kind: input, shape index: {}]   ;;  %s1600_s2 = inlined_call_operand.vmem [shape: f32[64,1], index: 2, kind: input, shape index: {}]   ;;  %s1601_s3 = inlined_call_operand.vmem [shape: f32[64,64], index: 3, kind: input, shape index: {}]   ;;  %s1602_s4 = inlined_call_operand.vmem [shape: f32[64,1], index: 4, kind: input, shape index: {}]   ;;  %s1603_s5 = inlined_call_operand.vmem [shape: f32[1,64], index: 5, kind: input, shape index: {}]   ;;  %s1604_s6 = inlined_call_operand.<no memory space> [shape: f32[1,1], index: 6, kind: input, shape index: {}]   ;;  %s1605_s7 = inlined_call_operand.hbm [shape: f32[1,256], index: 7, kind: output, shape index: {}]  }
   0x1   :  { %v12_v0 = vstv %s1604_s6 }
   0x2   :  { %13 = vst [vmem:[#allocation2] sm:$0x1] %v12_v0 }
   0x3   :  { %14 = vsyncpa [#allocation4], 0 }
   0x4   :  { %16 = vsyncpa [#allocation4 + $0x1], 0  ;;  %s1327_s26 = smov 0   ;;  %s1329_s27 = smov 0  }
   0x5   :  { %s1331_s28 = smov 0   ;;  %s1333_s29 = smov 0  }
   0x6 LB: > { %s906_s6 = sadd.s32 4294967295, %s1277_s29   ;;  %s907_s30 = sadd.s32 4294967294, %s1277_s29   ;;  %s1277_s29 = sphi %s1333_s29, %s1613_s29   ;;  %s1273_s28 = sphi %s1331_s28, %s1612_s28   ;;  %s1269_s27 = sphi %s1329_s27, %s1611_s27   ;;  %s1265_s26 = sphi %s1327_s26, %s1610_s26  }
   0x7   : > { %s1350_s8 = sadd.s32 1, %s1277_s29   ;;  %s181_s9 = sadd.s32 1, %s1273_s28 }
   0x8   : > { %s178_s10 = ssub.s32 %s1277_s29, %s1350_s8  ;;  %p191_p0 = scmp.ne.s32.totalorder %s1273_s28, %s1269_s27 }
   0x9   : > { %p179_p1 = scmp.eq.s32.totalorder %s178_s10, 0  ;;  %p192_p2 = scmp.eq.s32.totalorder %s906_s6, 1 }
   0xa   : > { %p197_p3 = scmp.ne.s32.totalorder %s1269_s27, %s1265_s26  ;;  %p198_p4 = scmp.eq.s32.totalorder %s907_s30, 1 }
   0xb   : > { %s1360_s11 = scalar_select %p179_p1, %s1273_s28, %s181_s9  }
   0xc   : > { %p1362_p5 = por %p192_p2, %p191_p0  ;;  %p1366_p6 = por %p198_p4, %p197_p3 }
   0xd   : > { %p910_p7 = scmp.ge.s32.totalorder %s1277_s29, 1  ;;  %p243_p8 = scmp.lt.s32.totalorder %s1277_s29, 3 }
   0xf   : > { %p244_p9 = pnand %p910_p7, %p243_p8 }
  0x10   : > { %s1372_s14 = sshll.u32 (!%p244_p9), %s906_s6, 4  ;;  %vm352_vm0 = vcmask (!%p244_p9), 261120   ;;  %v296_v1 = vld [vmem:[%s1599_s1] sm:$0xff] (!%p244_p9)  ;;  %v1279_v2 = vmov (!%p244_p9), 0   ;;  %v306_v4 = vld [vmem:[%s1600_s2 + $0x10] sm:$0xff] (!%p244_p9)  ;;  %v305_v5 = vld [vmem:[%s1600_s2 + $0x8] sm:$0xff] (!%p244_p9) }
  0x11   : > { %247 = sbr.rel (%p244_p9) target bundleno = 822 (0x336), region = 48  ;;  %p275_p10 = scmp.lt.s32.totalorder (!%p244_p9), %s1372_s14, 31  ;;  %1031 = vmatprep.mubr.msk.f32.mxu0 (!%p244_p9), %vm352_vm0, %v296_v1  ;;  %1209 = vset.pattern.permute.xlu0 (!%p244_p9), %v1279_v2  ;;  %v304_v3 = vld [vmem:[%s1600_s2] sm:$0xff] (!%p244_p9)  ;;  %v307_v6 = vld [vmem:[%s1600_s2 + $0x18] sm:$0xff] (!%p244_p9)  ;;  %vm1399_vm1 = vmpackc.low (!%p244_p9), %vm352_vm0, %vm352_vm0  ;;  %vm602_vm2 = vcmask (!%p244_p9), 523264   ;;  %vm1281_vm3 = vmmov (!%p244_p9), 0  }
  0x12   : > { %1210 = vset.pattern.permute.xlu1 (!%p244_p9), %v1279_v2  ;;  %314 = vperm.xlu0 (!%p244_p9), %1209, %v304_v3   ;;  %v308_v14 = vld [vmem:[%s1600_s2 + $0x20] sm:$0xff] (!%p244_p9)  ;;  %v309_v15 = vld [vmem:[%s1600_s2 + $0x28] sm:$0xff] (!%p244_p9)  ;;  %v310_v18 = vld [vmem:[%s1600_s2 + $0x30] sm:$0xff] (!%p244_p9)  ;;  %s272_s30 = sand.u32 (!%p244_p9), 1, %s1269_s27   ;;  %s1283_s20 = smov (!%p244_p9), [#allocation3]  }
  0x13   : > { %324 = vperm.xlu1 (!%p244_p9), %1210, %v306_v4   ;;  %v311_v19 = vld [vmem:[%s1600_s2 + $0x38] sm:$0xff] (!%p244_p9)  ;;  %v554_v21 = vld [vmem:[%s1602_s4] sm:$0xff] (!%p244_p9)  ;;  %v555_v22 = vld [vmem:[%s1602_s4 + $0x8] sm:$0xff] (!%p244_p9)  ;;  %s273_s9 = scalar_lea.vmem (!%p244_p9), [#allocation3], %s272_s30  ;;  %s840_s18 = scalar_lea.sflag (!%p244_p9), [#allocation4], %s272_s30 }
  0x14   : > { %v556_v25 = vld [vmem:[%s1602_s4 + $0x10] sm:$0xff] (!%p244_p9)  ;;  %v557_v26 = vld [vmem:[%s1602_s4 + $0x18] sm:$0xff] (!%p244_p9)  ;;  %v558_v28 = vld [vmem:[%s1602_s4 + $0x20] sm:$0xff] (!%p244_p9)  ;;  %s1219_s21 = sshll.u32 (!%p244_p9), %s1283_s20, 4  ;;  %s1220_s21 = int_to_ptr.vmem [resolvable:$false] %s1219_s21 }
  0x15   : > { %v559_v29 = vld [vmem:[%s1602_s4 + $0x28] sm:$0xff] (!%p244_p9)  ;;  %v560_v32 = vld [vmem:[%s1602_s4 + $0x30] sm:$0xff] (!%p244_p9)  ;;  %v561_v33 = vld [vmem:[%s1602_s4 + $0x38] sm:$0xff] (!%p244_p9) }
  0x16   : > { %319 = vperm.xlu0 (!%p244_p9), %1209, %v305_v5   ;;  %v749_v35 = vld [vmem:[#allocation2] sm:$0x1] (!%p244_p9)  ;;  %v297_v45 = vld [vmem:[%s1599_s1 + $0x8] sm:$0xff] (!%p244_p9)  ;;  %v298_v46 = vld [vmem:[%s1599_s1 + $0x10] sm:$0xff] (!%p244_p9) }
  0x17   : > { %329 = vperm.xlu1 (!%p244_p9), %1210, %v307_v6   ;;  %v299_v47 = vld [vmem:[%s1599_s1 + $0x18] sm:$0xff] (!%p244_p9)  ;;  %v300_v48 = vld [vmem:[%s1599_s1 + $0x20] sm:$0xff] (!%p244_p9)  ;;  %v301_v49 = vld [vmem:[%s1599_s1 + $0x28] sm:$0xff] (!%p244_p9) }
  0x18   : > { %s276_s17 = scalar_select %p275_p10, %s1372_s14, 31  ;;  %v302_v50 = vld [vmem:[%s1599_s1 + $0x30] sm:$0xff]  ;;  %v303_v51 = vld [vmem:[%s1599_s1 + $0x38] sm:$0xff]  ;;  %v546_v52 = vld [vmem:[%s1601_s3] sm:$0xff] }
  0x19   : > { %1059 = vmatprep.mubr.msk.f32.mxu1 %vm602_vm2, %v546_v52 }
  0x1a   : > { %s912_s22 = sshll.u32 %s276_s17, 3  ;;  %334 = vperm.xlu0 %1209, %v308_v14   ;;  %s1556_s17 = scalar_lea.hbm %s1605_s7, %s1372_s14 }
  0x1b   : > { %s1395_s10 = scalar_lea.vmem %s1598_s0, %s912_s22  ;;  %339 = vperm.xlu1 %1210, %v309_v15   ;;  %s1221_s22 = scalar_lea.vmem %s1220_s21, 32 }
  0x1c   : > { %v280_v8 = vld [vmem:[%s1395_s10] sm:$0xff]  ;;  %v281_v9 = vld [vmem:[%s1395_s10 + $0x8] sm:$0xff]  ;;  %v282_v10 = vld [vmem:[%s1395_s10 + $0x10] sm:$0xff] }
  0x1d   : > { %v1090_v11 = vpack.c.bf16 %v281_v9, %v280_v8  ;;  %v283_v12 = vld [vmem:[%s1395_s10 + $0x18] sm:$0xff]  ;;  %v284_v16 = vld [vmem:[%s1395_s10 + $0x20] sm:$0xff]  ;;  %v285_v17 = vld [vmem:[%s1395_s10 + $0x28] sm:$0xff] }
  0x1e   : > { %v1096_v13 = vpack.c.bf16 %v283_v12, %v282_v10  ;;  %v1102_v20 = vpack.c.bf16 %v285_v17, %v284_v16  ;;  %344 = vperm.xlu0 %1209, %v310_v18   ;;  %v286_v23 = vld [vmem:[%s1395_s10 + $0x30] sm:$0xff]  ;;  %v287_v24 = vld [vmem:[%s1395_s10 + $0x38] sm:$0xff]  ;;  %v288_v30 = vld [vmem:[%s1395_s10 + $0x40] sm:$0xff] }
  0x1f   : > { %1092 = vmatprep.subr.msk.bf16.mxu0 %vm1399_vm1, %v1090_v11  ;;  %349 = vperm.xlu1 %1210, %v311_v19   ;;  %v1108_v27 = vpack.c.bf16 %v287_v24, %v286_v23  ;;  %v289_v31 = vld [vmem:[%s1395_s10 + $0x48] sm:$0xff]  ;;  %v290_v36 = vld [vmem:[%s1395_s10 + $0x50] sm:$0xff]  ;;  %v291_v37 = vld [vmem:[%s1395_s10 + $0x58] sm:$0xff] }
  0x20   : > { %1095 = vmatpush3.bf16.xpose.msk.msra.mxu0 %vm1399_vm1, %v1090_v11  ;;  %v1114_v34 = vpack.c.bf16 %v289_v31, %v288_v30  ;;  %v1120_v38 = vpack.c.bf16 %v291_v37, %v290_v36  ;;  %v292_v39 = vld [vmem:[%s1395_s10 + $0x60] sm:$0xff]  ;;  %v293_v40 = vld [vmem:[%s1395_s10 + $0x68] sm:$0xff]  ;;  %v294_v42 = vld [vmem:[%s1395_s10 + $0x70] sm:$0xff] }
  0x21   : > { %1098 = vmatprep.subr.msk.bf16.mxu0 %vm1399_vm1, %v1096_v13  ;;  %v1126_v41 = vpack.c.bf16 %v293_v40, %v292_v39  ;;  %v295_v43 = vld [vmem:[%s1395_s10 + $0x78] sm:$0xff]  ;;  %v550_v36 = vld [vmem:[%s1601_s3 + $0x20] sm:$0xff]  ;;  %v551_v37 = vld [vmem:[%s1601_s3 + $0x28] sm:$0xff]  ;;  %v1280_v40 = vmov 0.0|0.0   ;;  %s852_s10 = sshll.u32 %s273_s9, 4  ;;  %s1558_s10 = int_to_ptr.vmem [resolvable:$true] %s852_s10 }
  0x22   : > { %564 = vperm.xlu0 %1209, %v554_v21   ;;  %v1132_v44 = vpack.c.bf16 %v295_v43, %v294_v42  ;;  %v553_v39 = vld [vmem:[%s1601_s3 + $0x38] sm:$0xff]  ;;  %s1215_s19 = scalar_lea.vmem %s1558_s10, 16  ;;  %p1222_p0 = scmp.lt.s32.totalorder %s1558_s10, %s1220_s21 }
  0x23   : > { %569 = vperm.xlu1 %1210, %v555_v22   ;;  %p1216_p11 = scmp.ne.s32.totalorder %s1558_s10, %s1215_s19  ;;  %p1223_p1 = scmp.lt.s32.totalorder %s1221_s22, %s1215_s19 }
  0x25   : > { %p1217_p12 = pnand %p1216_p11, %p1362_p5  ;;  %p1224_p2 = por %p1223_p1, %p1222_p0 }
  0x26   : > { %574 = vperm.xlu0 %1209, %v556_v25  }
  0x27   : > { %579 = vperm.xlu1 %1210, %v557_v26   ;;  %p1218_p13 = pneg %p1217_p12 }
  0x28   : > { %1101 = vmatpush3.bf16.xpose.msk.msra.mxu0 %vm1399_vm1, %v1096_v13 }
  0x29   : > { %1104 = vmatprep.subr.msk.bf16.mxu0 %vm1399_vm1, %v1102_v20  ;;  %p1225_p3 = pnand %p1224_p2, %p1218_p13 }
  0x2a   : > { %584 = vperm.xlu0 %1209, %v558_v28  }
  0x2b   : > { %589 = vperm.xlu1 %1210, %v559_v29  }
  0x2e   : > { %594 = vperm.xlu0 %1209, %v560_v32  }
  0x2f   : > { %599 = vperm.xlu1 %1210, %v561_v33   ;;  %v547_v33 = vld [vmem:[%s1601_s3 + $0x8] sm:$0xff] }
  0x30   : > { %1107 = vmatpush3.bf16.xpose.msk.msra.mxu0 %vm1399_vm1, %v1102_v20 }
  0x31   : > { %1110 = vmatprep.subr.msk.bf16.mxu0 %vm1399_vm1, %v1108_v27 }
  0x32   : > { %752 = vperm.xlu0 %1209, %v749_v35   ;;  %v549_v35 = vld [vmem:[%s1601_s3 + $0x18] sm:$0xff] }
  0x38   : > { %1113 = vmatpush3.bf16.xpose.msk.msra.mxu0 %vm1399_vm1, %v1108_v27 }
  0x39   : > { %1116 = vmatprep.subr.msk.bf16.mxu0 %vm1399_vm1, %v1114_v34 }
  0x40   : > { %1119 = vmatpush3.bf16.xpose.msk.msra.mxu0 %vm1399_vm1, %v1114_v34  ;;  %v548_v34 = vld [vmem:[%s1601_s3 + $0x10] sm:$0xff] }
  0x41   : > { %1122 = vmatprep.subr.msk.bf16.mxu0 %vm1399_vm1, %v1120_v38 }
  0x48   : > { %1125 = vmatpush3.bf16.xpose.msk.msra.mxu0 %vm1399_vm1, %v1120_v38  ;;  %v552_v38 = vld [vmem:[%s1601_s3 + $0x30] sm:$0xff] }
  0x49   : > { %1128 = vmatprep.subr.msk.bf16.mxu0 %vm1399_vm1, %v1126_v41 }
  0x50   : > { %1131 = vmatpush3.bf16.xpose.msk.msra.mxu0 %vm1399_vm1, %v1126_v41  ;;  %v1282_v41 = vmov 0.0  }
  0x51   : > { %1134 = vmatprep.subr.msk.bf16.mxu0 %vm1399_vm1, %v1132_v44 }
  0x58   : > { %1137 = vmatpush3.bf16.xpose.msk.msra.mxu0 %vm1399_vm1, %v1132_v44 }
  0x5f   : > { %1032 = vmatmul.mubr.msk.f32.vlgmr.msra.gmra.mrb[0].mxu0 %vm352_vm0, %v297_v45 }
  0x60   : > { %1034 = vmatprep.mubr.msk.f32.mxu0 %vm352_vm0, %v298_v46 }
  0x63   : > { %1035 = vmatmul.mubr.msk.f32.gmra.mrb[2].mxu0 %vm352_vm0, %v299_v47 }
  0x64   : > { %1037 = vmatprep.mubr.msk.f32.mxu0 %vm352_vm0, %v300_v48 }
  0x67   : > { %1038 = vmatmul.mubr.msk.f32.gmra.mrb[4].mxu0 %vm352_vm0, %v301_v49 }
  0x68   : > { %1040 = vmatprep.mubr.msk.f32.mxu0 %vm352_vm0, %v302_v50 }
  0x6b   : > { %1041 = vmatmul.mubr.msk.f32.gmra.mrb[6].mxu0 %vm352_vm0, %v303_v51 }
  0x91   : > { %v315_v53 = vpop.permute.xlu0 %314 }
  0x92   : > { %v325_v54 = vpop.permute.xlu1 %324 }
  0x95   : > { %v320_v55 = vpop.permute.xlu0 %319 }
  0x96   : > { %v330_v56 = vpop.permute.xlu1 %329 }
  0x99   : > { %v335_v6 = vpop.permute.xlu0 %334 }
  0x9a   : > { %v340_v3 = vpop.permute.xlu1 %339 }
  0x9d   : > { %v345_v21 = vpop.permute.xlu0 %344 }
  0x9e   : > { %v350_v17 = vpop.permute.xlu1 %349 }
  0xa1   : > { %v565_v43 = vpop.permute.xlu0 %564 }
  0xa2   : > { %v570_v42 = vpop.permute.xlu1 %569 }
  0xa5   : > { %v575_v46 = vpop.permute.xlu0 %574 }
  0xa6   : > { %v580_v44 = vpop.permute.xlu1 %579 }
 0x132   : > { %v1033_v57 = vpop.f32.mrb[0].mxu0 }
 0x133   : > { %v497_v58 = vadd.f32 %v1033_v57, %v320_v55  ;;  %v491_v59 = vpop.f32.mrb[1].mxu0 }
 0x134   : > { %v492_v60 = vadd.f32 %v491_v59, %v315_v53  ;;  %v585_v59 = vpop.permute.xlu0 %584 }
 0x135   : > { %v531_v61 = vmul.f32 0.01, %v497_v58 }
 0x136   : > { %v530_v62 = vmul.f32 0.01, %v492_v60  ;;  %v1036_v63 = vpop.f32.mrb[2].mxu0 }
 0x137   : > { %v539_v0 = vmax.f32 %v497_v58, %v531_v61  ;;  %v507_v1 = vadd.f32 %v1036_v63, %v330_v56  ;;  %v501_v2 = vpop.f32.mrb[3].mxu0  ;;  %v590_v56 = vpop.permute.xlu1 %589 }
 0x138   : > { %v538_v4 = vmax.f32 %v492_v60, %v530_v62  ;;  %v502_v5 = vadd.f32 %v501_v2, %v325_v54 }
 0x139   : > { %v533_v7 = vmul.f32 0.01, %v507_v1 }
 0x13a   : > { %v532_v8 = vmul.f32 0.01, %v502_v5  ;;  %v1039_v9 = vpop.f32.mrb[4].mxu0  ;;  %v1138_v10 = vpack.c.bf16 %v539_v0, %v538_v4 }
 0x13b   : > { %v541_v11 = vmax.f32 %v507_v1, %v533_v7  ;;  %v517_v12 = vadd.f32 %v1039_v9, %v340_v3  ;;  %v511_v13 = vpop.f32.mrb[5].mxu0 }
 0x13c   : > { %v540_v14 = vmax.f32 %v502_v5, %v532_v8  ;;  %v512_v15 = vadd.f32 %v511_v13, %v335_v6  ;;  %1139 = vmatprep.subr.bf16.mxu1 %v1138_v10  ;;  %v600_v6 = vpop.permute.xlu1 %599 }
 0x13d   : > { %v535_v16 = vmul.f32 0.01, %v517_v12  ;;  %1141 = vmatpush3.bf16.msra.mxu1 %v1138_v10  ;;  %v595_v10 = vpop.permute.xlu0 %594 }
 0x13e   : > { %v534_v18 = vmul.f32 0.01, %v512_v15  ;;  %v1042_v19 = vpop.f32.mrb[6].mxu0  ;;  %v1142_v20 = vpack.c.bf16 %v541_v11, %v540_v14 }
 0x13f   : > { %v543_v22 = vmax.f32 %v517_v12, %v535_v16  ;;  %v527_v23 = vadd.f32 %v1042_v19, %v350_v17  ;;  %v521_v24 = vpop.f32.mrb[7].mxu0 }
 0x140   : > { %v542_v25 = vmax.f32 %v512_v15, %v534_v18  ;;  %v522_v26 = vadd.f32 %v521_v24, %v345_v21  ;;  %1143 = vmatprep.subr.bf16.mxu1 %v1142_v20 }
 0x141   : > { %v537_v27 = vmul.f32 0.01, %v527_v23  ;;  %1145 = vmatpush3.bf16.msra.mxu1 %v1142_v20 }
 0x142   : > { %v536_v28 = vmul.f32 0.01, %v522_v26  ;;  %v1146_v29 = vpack.c.bf16 %v543_v22, %v542_v25  ;;  %v748_v22 = vld [vmem:[%s1603_s5] sm:$0x1] }
 0x143   : > { %v545_v30 = vmax.f32 %v527_v23, %v537_v27  ;;  %v755_v23 = vlaneseq }
 0x144   : > { %v544_v31 = vmax.f32 %v522_v26, %v536_v28  ;;  %1147 = vmatprep.subr.bf16.mxu1 %v1146_v29  ;;  %v753_v26 = vpop.permute.xlu0 %752 }
 0x145   : > { %1149 = vmatpush3.bf16.msra.mxu1 %v1146_v29  ;;  %v756_v24 = vshrl.u32 %v755_v23, 7 }
 0x146   : > { %v1150_v32 = vpack.c.bf16 %v545_v30, %v544_v31 }
 0x147   : > { %v757_v25 = vsub.s32 0, %v756_v24 }
 0x148   : > { %1151 = vmatprep.subr.bf16.mxu1 %v1150_v32 }
 0x149   : > { %1153 = vmatpush3.bf16.msra.mxu1 %v1150_v32  ;;  %v758_v27 = vrot.slane %v753_v26, %v757_v25 }
 0x14a   : > { %1154 = vmatprep.subr.bf16.mxu1 %v1280_v40 }
 0x14c   : > { %1060 = vmatmul.mubr.msk.f32.vlgmr.msra.gmra.mrb[0].mxu1 %vm602_vm2, %v547_v33 }
 0x14d   : > { %1062 = vmatprep.mubr.msk.f32.mxu1 %vm602_vm2, %v548_v34 }
 0x150   : > { %1063 = vmatmul.mubr.msk.f32.gmra.mrb[2].mxu1 %vm602_vm2, %v549_v35 }
 0x151   : > { %1065 = vmatprep.mubr.msk.f32.mxu1 %vm602_vm2, %v550_v36 }
 0x154   : > { %1066 = vmatmul.mubr.msk.f32.gmra.mrb[4].mxu1 %vm602_vm2, %v551_v37 }
 0x155   : > { %1068 = vmatprep.mubr.msk.f32.mxu1 %vm602_vm2, %v552_v38 }
 0x158   : > { %1069 = vmatmul.mubr.msk.f32.gmra.mrb[6].mxu1 %vm602_vm2, %v553_v39 }
 0x159   : > { %1087 = vmatprep.mubr.msk.f32.mxu1 %vm1281_vm3, %v1282_v41 }
 0x21f   : > { %v1061_v45 = vpop.f32.mrb[0].mxu1 }
 0x220   : > { %v699_v47 = vadd.f32 %v1061_v45, %v570_v42  ;;  %v693_v48 = vpop.f32.mrb[1].mxu1 }
 0x221   : > { %v694_v49 = vadd.f32 %v693_v48, %v565_v43 }
 0x222   : > { %v733_v50 = vmul.f32 0.01, %v699_v47 }
 0x223   : > { %v732_v51 = vmul.f32 0.01, %v694_v49  ;;  %v1064_v52 = vpop.f32.mrb[2].mxu1 }
 0x224   : > { %v741_v53 = vmax.f32 %v699_v47, %v733_v50  ;;  %v709_v54 = vadd.f32 %v1064_v52, %v580_v44  ;;  %v703_v55 = vpop.f32.mrb[3].mxu1 }
 0x225   : > { %v740_v57 = vmax.f32 %v694_v49, %v732_v51  ;;  %v704_v58 = vadd.f32 %v703_v55, %v575_v46 }
 0x226   : > { %v735_v60 = vmul.f32 0.01, %v709_v54 }
 0x227   : > { %v1155_v61 = vpack.c.bf16 %v741_v53, %v740_v57  ;;  %v734_v62 = vmul.f32 0.01, %v704_v58  ;;  %v1067_v63 = vpop.f32.mrb[4].mxu1 }
 0x228   : > { %v743_v0 = vmax.f32 %v709_v54, %v735_v60  ;;  %v719_v1 = vadd.f32 %v1067_v63, %v590_v56  ;;  %v713_v2 = vpop.f32.mrb[5].mxu1 }
 0x229   : > { %v742_v3 = vmax.f32 %v704_v58, %v734_v62  ;;  %v714_v4 = vadd.f32 %v713_v2, %v585_v59  ;;  %1156 = vmatpush3.bf16.msra.mxu1 %v1155_v61 }
 0x22a   : > { %v737_v5 = vmul.f32 0.01, %v719_v1  ;;  %1157 = vmatprep.subr.bf16.mxu1 %v1280_v40 }
 0x22b   : > { %v1158_v7 = vpack.c.bf16 %v743_v0, %v742_v3  ;;  %v736_v8 = vmul.f32 0.01, %v714_v4  ;;  %v1070_v9 = vpop.f32.mrb[6].mxu1 }
 0x22c   : > { %v745_v11 = vmax.f32 %v719_v1, %v737_v5  ;;  %v729_v12 = vadd.f32 %v1070_v9, %v600_v6  ;;  %v723_v13 = vpop.f32.mrb[7].mxu1 }
 0x22d   : > { %v744_v14 = vmax.f32 %v714_v4, %v736_v8  ;;  %v724_v15 = vadd.f32 %v723_v13, %v595_v10  ;;  %1159 = vmatpush3.bf16.msra.mxu1 %v1158_v7 }
 0x22e   : > { %v739_v16 = vmul.f32 0.01, %v729_v12  ;;  %1160 = vmatprep.subr.bf16.mxu1 %v1280_v40 }
 0x22f   : > { %v1161_v17 = vpack.c.bf16 %v745_v11, %v744_v14  ;;  %v738_v18 = vmul.f32 0.01, %v724_v15 }
 0x230   : > { %v747_v19 = vmax.f32 %v729_v12, %v739_v16 }
 0x231   : > { %v746_v20 = vmax.f32 %v724_v15, %v738_v18  ;;  %1162 = vmatpush3.bf16.msra.mxu1 %v1161_v17 }
 0x232   : > { %1163 = vmatprep.subr.bf16.mxu1 %v1280_v40 }
 0x233   : > { %v1164_v21 = vpack.c.bf16 %v747_v19, %v746_v20 }
 0x235   : > { %1165 = vmatpush3.bf16.msra.mxu1 %v1164_v21 }
 0x238   : > { %1088 = vmatmul.mubr.msk.f32.vlgmr.msra.gmra.mrb[8].mxu1 %vm602_vm2, %v748_v22 }
 0x30b   : > { %v828_v28 = vpop.f32.mrb[8].mxu1 }
 0x30c   : > { %v829_v29 = vadd.f32 %v828_v28, %v758_v27  ;;  %v1089_v30 = vpop.f32.mrb[9].mxu1 }
 0x30e   : > { %v946_v31 = vmul.f32 -1.442695, %v829_v29 }
 0x310   : > { %1211 = vpow2.f32 %v946_v31 }
 0x31a   : > { %v1212_v32 = vpop.eup %1211 }
 0x31b   : > { %v835_v33 = vadd.f32 1.0, %v1212_v32 }
 0x31d   : > { %1213 = vrcp.f32 %v835_v33 }
 0x327   : > { %v1214_v34 = vpop.eup %1213 }
 0x328   : > { %838 = vst [vmem:[%s273_s9] sm:$0x1] %v1214_v34 }
 0x329   : > { %1228 = shalt.err (!%p1225_p3)
}
 0x32a   : > { %s1229_s14 = scalar_lea.hbm %s1556_s17, 16  ;;  %s1233_s25 = scalar_lea.hbm %s1605_s7, 32 }
 0x32b   : > { %p1230_p4 = scmp.ne.s32.totalorder %s1556_s17, %s1229_s14  ;;  %p1234_p9 = scmp.lt.u32.totalorder %s1556_s17, %s1605_s7 }
 0x32c   : > { %p1235_p10 = scmp.lt.u32.totalorder %s1233_s25, %s1229_s14  ;;  %p1237_p12 = scmp.lt.u32.totalorder %s1229_s14, %s1556_s17 }
 0x32d   : > { %p1231_p7 = pnand %p1230_p4, %p1362_p5 }
 0x32e   : > { %p1236_p11 = por %p1235_p10, %p1234_p9 }
 0x32f   : > { %p1232_p8 = pneg %p1231_p7 }
 0x330   : > { %p1238_p13 = por %p1237_p12, %p1236_p11 }
 0x332   : > { %p1239_p0 = pnand %p1238_p13, %p1232_p8 }
 0x334   : > { %1242 = shalt.err (!%p1239_p0)
}
 0x335   : > { %1166 = dma.vmem_to_hbm [thread:$0]  (%p1362_p5), %s1558_s10, 16, %s1556_s17, %s840_s18  }
 0x336 PF: > { %p1172_p1 = scmp.ge.s32.totalorder %s1277_s29, 2  ;;  %s864_s9 = sand.u32 1, %s1265_s26  }
 0x337   : > { %s865_s15 = scalar_lea.sflag [#allocation4], %s864_s9 }
 0x338   : > { %p1169_p2 = pnand %p1172_p1, %p1366_p6 }
 0x33a   : > { %1260 = dma.done.wait (!%p1169_p2), %s865_s15, 16  }
 0x33b   : > { %1262 = vsyncadd (!%p1169_p2), %s865_s15, 4294967280  ;;  %p19_p3 = scmp.ge.s32.totalorder %s1350_s8, 4   ;;  %s1610_s26 = smov %s1269_s27 }
 0x33c   : > { %s1611_s27 = smov %s1273_s28  ;;  %s1612_s28 = smov %s1360_s11 }
 0x33d   : > { %s1613_s29 = smov %s1350_s8  ;;  %21 = sbr.rel (!%p19_p3) target bundleno = 6 (0x6), region = 83 }
 0x344   :  { %869 = vsyncpa [#allocation4], 1 }
 0x345   :  { %871 = vsyncpa [#allocation4 + $0x1], 1 }

</bundles_post_ra>
